<compile_context>
chip_gen: v7x
topology: tpu7x:2x2x1
jax: 0.10.0
libtpu: 0.0.40
codegen_flags: <defaults>
</compile_context>

<pallas_src>
import functools

import jax
import jax.numpy as jnp
from jax.experimental import pallas as pl
from jax.experimental.pallas import tpu as pltpu


def _round_up(x, m):
    return ((x + m - 1) // m) * m


# Largest padded N for which bf16 A (<= 8 MiB) stays VMEM-resident for all K
# steps in one kernel.
_FAST_PATH_MAX_N = 2048
_TK = 512  # contraction tile for the tiled (large-graph) path


def _vmem_limit_bytes():
    """Safe scoped-VMEM limit per generation (v7x has only 64 MiB physical)."""
    try:
        cap = getattr(pltpu.get_tpu_info(), "vmem_capacity_bytes",
                      64 * 1024 * 1024)
    except Exception:  # CPU tracing / interpret mode
        cap = 64 * 1024 * 1024
    return min(48 * 1024 * 1024, (cap * 3) // 4)


def _select_tiles(N):
    """Row/contraction tiles for the tiled path (N > _FAST_PATH_MAX_N).

    Prefer the tile giving the least A padding, then the largest row tile
    (less x_k re-streaming), while keeping >= 2 row tiles so the "parallel"
    axis shards across both TensorCores on v7x.
    """
    best = None
    for tm in (2048, 1024, 512):
        n_pad = _round_up(N, tm)
        if n_pad // tm < 2:
            continue
        key = (n_pad, -tm)  # least padding first, then biggest tm
        if best is None or key < best[0]:
            best = (key, tm, n_pad)
    _, tm, n_pad = best
    return tm, _TK, n_pad  # tm is a multiple of _TK, so n_pad % tk == 0


def prepare_graph(a_hat):
    """Pad + bf16-cast A_hat once (hoisted out of the forward pass).

    Returns (a_pad_bf16, tiles); tiles is None for the VMEM-resident fast path.
    """
    N = a_hat.shape[0]
    if N <= _FAST_PATH_MAX_N:
        n_pad = _round_up(N, 128)  # lane-dense single resident block
        tiles = None
    else:
        tm, tk, n_pad = _select_tiles(N)
        tiles = (tm, tk)
    a_pad = (
        jnp.zeros((n_pad, n_pad), jnp.bfloat16)
        .at[:N, :N]
        .set(a_hat.astype(jnp.bfloat16))
    )
    return a_pad, tiles


# ----------------------------------------------------------------------------
# Fast path: whole graph resident in VMEM, all K steps in one kernel.
# ----------------------------------------------------------------------------
def _resident_kernel(a_ref, x0_ref, o_ref, *, K, alpha):
    a = a_ref[...]                       # bf16 (n_pad, n_pad), VMEM resident
    x0 = x0_ref[...]                     # f32  (n_pad, D)
    x = x0
    for _ in range(K):                   # K is small & static -> unrolled
        ax = jnp.dot(a, x.astype(jnp.bfloat16),
                     preferred_element_type=jnp.float32)
        x = (1.0 - alpha) * ax + alpha * x0
    o_ref[...] = x.astype(o_ref.dtype)


def _propagate_resident(a_pad, x0, K, alpha):
    n_pad, d = x0.shape
    return pl.pallas_call(
        functools.partial(_resident_kernel, K=K, alpha=alpha),
        out_shape=jax.ShapeDtypeStruct((n_pad, d), jnp.float32),
        compiler_params=pltpu.CompilerParams(
            vmem_limit_bytes=_vmem_limit_bytes()),
    )(a_pad, x0)


# ----------------------------------------------------------------------------
# Tiled path: one propagation step  out = (1 - alpha) * A @ x + alpha * x0
# grid = (row tiles, contraction tiles), f32 VMEM accumulator, pl.when
# init/finalize, bf16 A stream, un-padded D activations.
# ----------------------------------------------------------------------------
def _prop_step_kernel(a_ref, x_ref, x0_ref, o_ref, acc_ref, *, alpha):
    k = pl.program_id(1)

    @pl.when(k == 0)
    def _():
        acc_ref[...] = jnp.zeros_like(acc_ref)

    acc_ref[...] += jnp.dot(
        a_ref[...], x_ref[...].astype(jnp.bfloat16),
        preferred_element_type=jnp.float32)

    @pl.when(k == pl.num_programs(1) - 1)
    def _():
        o_ref[...] = ((1.0 - alpha) * acc_ref[...]
                      + alpha * x0_ref[...]).astype(o_ref.dtype)


def _propagation_step(a_pad, x, x0, alpha, tm, tk):
    n_pad, d = x.shape
    assert n_pad % tm == 0 and n_pad % tk == 0
    grid = (n_pad // tm, n_pad // tk)
    return pl.pallas_call(
        functools.partial(_prop_step_kernel, alpha=alpha),
        out_shape=jax.ShapeDtypeStruct((n_pad, d), jnp.float32),
        grid_spec=pltpu.PrefetchScalarGridSpec(
            num_scalar_prefetch=0,
            grid=grid,
            in_specs=[
                # A (bf16): rows follow the output-row axis, cols contraction.
                pl.BlockSpec((tm, tk), lambda i, k: (i, k)),
                # x_k: contraction axis; last dim == full D (no 128 padding).
                pl.BlockSpec((tk, d), lambda i, k: (k, 0)),
                # x_0: same block across k -> fetched once per row tile.
                pl.BlockSpec((tm, d), lambda i, k: (i, 0)),
            ],
            out_specs=pl.BlockSpec((tm, d), lambda i, k: (i, 0)),
            scratch_shapes=[pltpu.VMEM((tm, d), jnp.float32)],
        ),
        compiler_params=pltpu.CompilerParams(
            # Row tiles are independent -> "parallel" (shards across the 2 TCs
            # on v7x); contraction carries the accumulator -> "arbitrary".
            dimension_semantics=("parallel", "arbitrary"),
            vmem_limit_bytes=_vmem_limit_bytes()),
    )(a_pad, x, x0)


def propagate(a_pad, all_emb, K, alpha, tiles=None):
    """K-step propagation  x_{k+1} = (1 - alpha) * A_hat @ x_k + alpha * x_0."""
    N, D = all_emb.shape
    n_pad = a_pad.shape[0]
    x0 = jnp.zeros((n_pad, D), jnp.float32).at[:N, :].set(
        all_emb.astype(jnp.float32))
    if tiles is None:
        out = _propagate_resident(a_pad, x0, K, alpha)
    else:
        tm, tk = tiles
        x = x0
        for _ in range(K):  # true sequential dependency across K
            x = _propagation_step(a_pad, x, x0, alpha, tm, tk)
        out = x
    return out[:N]


# ----------------------------------------------------------------------------
# GTN forward.
# ----------------------------------------------------------------------------
def gtn_forward(user_emb, item_emb, a_pad, users, items, *, K, alpha,
                tiles=None):
    num_users = user_emb.shape[0]
    all_emb = jnp.concatenate([user_emb, item_emb], axis=0)       # [N, D]
    light_out = propagate(a_pad, all_emb, K, alpha, tiles)        # [N, D]
    all_users = light_out[:num_users]
    all_items = light_out[num_users:]
    # Per perf review: at B=8, D=32 a standalone score kernel is pure launch +
    # masked-store overhead, so the gather + dot is left to XLA (it fuses it).
    users_emb = all_users[users]                                  # [B, D]
    items_emb = all_items[items]                                  # [B, D]
    return jnp.sum(users_emb * items_emb, axis=-1)                # [B]


# ----------------------------------------------------------------------------
# Deterministic parameter / graph construction (synthetic, no checkpoint).
# ----------------------------------------------------------------------------
def build_inputs(n_users=8, m_items=16, latent_dim=32, seed=0):
    key = jax.random.PRNGKey(seed)
    k_u, k_i, k_g = jax.random.split(key, 3)

    # nn.init.normal_(std=0.1) on both embedding tables
    user_emb = 0.1 * jax.random.normal(k_u, (n_users, latent_dim), jnp.float32)
    item_emb = 0.1 * jax.random.normal(k_i, (m_items, latent_dim), jnp.float32)

    # synthetic bipartite interaction matrix R: users x items
    R = (jax.random.uniform(k_g, (n_users, m_items)) < 0.3).astype(jnp.float32)

    N = n_users + m_items
    A = jnp.zeros((N, N), jnp.float32)
    A = A.at[:n_users, n_users:].set(R)
    A = A.at[n_users:, :n_users].set(R.T)

    # symmetric normalization D^{-1/2} A D^{-1/2} (same as getSparseGraph)
    deg = jnp.sum(A, axis=1)
    d_inv_sqrt = jnp.where(deg > 0, 1.0 / jnp.sqrt(deg), 0.0)
    a_hat = A * d_inv_sqrt[:, None] * d_inv_sqrt[None, :]

    return user_emb, item_emb, a_hat


if __name__ == "__main__":
    n_users, m_items, latent_dim = 8, 16, 32
    K, alpha = 3, 0.1

    user_emb, item_emb, a_hat = build_inputs(n_users, m_items, latent_dim)
    users = jnp.array([0, 1, 2, 3, 4, 5, 6, 7], dtype=jnp.int32)
    items = jnp.array([3, 1, 7, 0, 15, 9, 2, 11], dtype=jnp.int32)

    # Pad + bf16-cast A_hat once (graph constant), not inside the forward.
    a_pad, tiles = prepare_graph(a_hat)

    # Auto path (small graph -> single VMEM-resident kernel for all K steps).
    fwd = jax.jit(functools.partial(gtn_forward, K=K, alpha=alpha, tiles=tiles))
    gamma = jax.block_until_ready(fwd(user_emb, item_emb, a_pad, users, items))

    # Also exercise the tiled (large-graph) path on the same small problem.
    fwd_tiled = jax.jit(functools.partial(
        gtn_forward, K=K, alpha=alpha, tiles=(128, 128)))
    gamma_tiled = jax.block_until_ready(
        fwd_tiled(user_emb, item_emb, a_pad, users, items))

    # Plain-JAX f32 reference (bf16 A stream => tolerance check, not bitwise).
    all_emb = jnp.concatenate([user_emb, item_emb], axis=0)
    x = all_emb
    for _ in range(K):
        x = (1.0 - alpha) * (a_hat @ x) + alpha * all_emb
    ref_gamma = jnp.sum(x[:n_users][users] * x[n_users:][items], axis=-1)

    assert gamma.shape == (users.shape[0],)
    assert bool(jnp.all(jnp.isfinite(gamma)))
    assert bool(jnp.allclose(gamma, ref_gamma, rtol=5e-2, atol=2e-3))
    assert bool(jnp.allclose(gamma_tiled, ref_gamma, rtol=5e-2, atol=2e-3))
    print("KERNEL_OK")
</pallas_src>

<mosaic_0001>
module attributes {stable_mosaic.version = 11 : i64} {
  func.func @_resident_kernel(%arg0: memref<128x128xbf16, #tpu.memory_space<vmem>>, %arg1: memref<128x32xf32, #tpu.memory_space<vmem>>, %arg2: memref<128x32xf32, #tpu.memory_space<vmem>>) attributes {dimension_semantics = [], scalar_prefetch = 0 : i64, scratch_operands = 0 : i64, tpu.core_type = #tpu.core_type<tc>} {
    %c0 = arith.constant 0 : index
    %c0_0 = arith.constant 0 : index
    %0 = vector.load %arg0[%c0, %c0_0] : memref<128x128xbf16, #tpu.memory_space<vmem>>, vector<128x128xbf16>
    %c0_1 = arith.constant 0 : index
    %c0_2 = arith.constant 0 : index
    %1 = vector.load %arg1[%c0_1, %c0_2] : memref<128x32xf32, #tpu.memory_space<vmem>>, vector<128x32xf32>
    %2 = arith.truncf %1 : vector<128x32xf32> to vector<128x32xbf16>
    %cst = arith.constant dense<0.000000e+00> : vector<128x32xf32>
    %3 = tpu.matmul %0, %2, %cst {dimension_numbers = #tpu.dot_dimension_numbers<[1], [0], [0], [1], [0, 0, 1, 1], [], []>} : vector<128x128xbf16>, vector<128x32xbf16>, vector<128x32xf32> -> vector<128x32xf32>
    %cst_3 = arith.constant 0.899999976 : f32
    %4 = vector.broadcast %cst_3 : f32 to vector<128x32xf32>
    %5 = arith.mulf %4, %3 : vector<128x32xf32>
    %cst_4 = arith.constant 1.000000e-01 : f32
    %6 = vector.broadcast %cst_4 : f32 to vector<128x32xf32>
    %7 = arith.mulf %6, %1 : vector<128x32xf32>
    %8 = arith.addf %5, %7 : vector<128x32xf32>
    %9 = arith.truncf %8 : vector<128x32xf32> to vector<128x32xbf16>
    %cst_5 = arith.constant dense<0.000000e+00> : vector<128x32xf32>
    %10 = tpu.matmul %0, %9, %cst_5 {dimension_numbers = #tpu.dot_dimension_numbers<[1], [0], [0], [1], [0, 0, 1, 1], [], []>} : vector<128x128xbf16>, vector<128x32xbf16>, vector<128x32xf32> -> vector<128x32xf32>
    %cst_6 = arith.constant 0.899999976 : f32
    %11 = vector.broadcast %cst_6 : f32 to vector<128x32xf32>
    %12 = arith.mulf %11, %10 : vector<128x32xf32>
    %cst_7 = arith.constant 1.000000e-01 : f32
    %13 = vector.broadcast %cst_7 : f32 to vector<128x32xf32>
    %14 = arith.mulf %13, %1 : vector<128x32xf32>
    %15 = arith.addf %12, %14 : vector<128x32xf32>
    %16 = arith.truncf %15 : vector<128x32xf32> to vector<128x32xbf16>
    %cst_8 = arith.constant dense<0.000000e+00> : vector<128x32xf32>
    %17 = tpu.matmul %0, %16, %cst_8 {dimension_numbers = #tpu.dot_dimension_numbers<[1], [0], [0], [1], [0, 0, 1, 1], [], []>} : vector<128x128xbf16>, vector<128x32xbf16>, vector<128x32xf32> -> vector<128x32xf32>
    %cst_9 = arith.constant 0.899999976 : f32
    %18 = vector.broadcast %cst_9 : f32 to vector<128x32xf32>
    %19 = arith.mulf %18, %17 : vector<128x32xf32>
    %cst_10 = arith.constant 1.000000e-01 : f32
    %20 = vector.broadcast %cst_10 : f32 to vector<128x32xf32>
    %21 = arith.mulf %20, %1 : vector<128x32xf32>
    %22 = arith.addf %19, %21 : vector<128x32xf32>
    %c0_11 = arith.constant 0 : index
    %c0_12 = arith.constant 0 : index
    %23 = vector.load %arg2[%c0_11, %c0_12] : memref<128x32xf32, #tpu.memory_space<vmem>>, vector<128x32xf32>
    tpu.vector_store %arg2[%c0_11, %c0_12], %22 {strides = array<i32>} : memref<128x32xf32, #tpu.memory_space<vmem>>, vector<128x32xf32>,
    return
  }
}

</mosaic_0001>

<bundles_post_ra>
// kernel: gtn_forward.1
= control target key start
LH: loop header
LB: loop body
LE: loop exit
PB: predicated region body
PF: predicated region fallthrough
CT: control target
= control target key end

     0   :  { %vm519_vm0 = vcmask 261120   ;;  %s1034_s1 = inlined_call_operand.vmem [shape: f32[128,32], index: 1, kind: input, shape index: {}]   ;;  %s1035_s0 = inlined_call_operand.vmem [shape: bf16[128,128], index: 0, kind: input, shape index: {}]   ;;  %s1036_s2 = inlined_call_operand.vmem [shape: f32[128,32], index: 2, kind: output, shape index: {}]  }
   0x1   :  { %v28_v0 = vld [vmem:[%s1034_s1] sm:$0xff]  ;;  %v737_v1 = vld [vmem:[%s1034_s1 + $0x8] sm:$0xff]  ;;  %v30_v2 = vld [vmem:[%s1034_s1 + $0x10] sm:$0xff] }
   0x2   :  { %v44_v3 = vpack.c.bf16 %v737_v1, %v28_v0  ;;  %v31_v4 = vld [vmem:[%s1034_s1 + $0x18] sm:$0xff]  ;;  %v749_v6 = vld [vmem:[%s1034_s1 + $0x20] sm:$0xff]  ;;  %v754_v7 = vld [vmem:[%s1034_s1 + $0x28] sm:$0xff]  ;;  %v863_v32 = vmul.f32 0.1, %v28_v0 }
   0x3   :  { %v45_v5 = vpack.c.bf16 %v31_v4, %v30_v2  ;;  %v46_v8 = vpack.c.bf16 %v754_v7, %v749_v6  ;;  %v761_v9 = vld [vmem:[%s1034_s1 + $0x30] sm:$0xff]  ;;  %v766_v10 = vld [vmem:[%s1034_s1 + $0x38] sm:$0xff]  ;;  %v708_v11 = vld [vmem:[%s1035_s0] sm:$0xff]   ;;  %v865_v33 = vmul.f32 0.1, %v30_v2 }
   0x4   :  { %596 = vmatprep.subr.bf16.mxu0 %v44_v3  ;;  %v774_v12 = vld [vmem:[%s1034_s1 + $0x40] sm:$0xff]  ;;  %v47_v13 = vpack.c.bf16 %v766_v10, %v761_v9  ;;  %612 = vmatprep.mubr.bf16.mxu0 %v708_v11  ;;  %v781_v14 = vld [vmem:[%s1034_s1 + $0x48] sm:$0xff]  ;;  %v788_v16 = vld [vmem:[%s1034_s1 + $0x50] sm:$0xff]  ;;  %v867_v35 = vmul.f32 0.1, %v31_v4 }
   0x5   :  { %597 = vmatpush3.bf16.msra.mxu0 %v44_v3  ;;  %644 = vmatprep.mubr.bf16.mxu1 %v708_v11  ;;  %v48_v15 = vpack.c.bf16 %v781_v14, %v774_v12  ;;  %v793_v17 = vld [vmem:[%s1034_s1 + $0x58] sm:$0xff]  ;;  %v800_v19 = vld [vmem:[%s1034_s1 + $0x60] sm:$0xff]  ;;  %v805_v20 = vld [vmem:[%s1034_s1 + $0x68] sm:$0xff]  ;;  %v870_v38 = vmul.f32 0.1, %v737_v1 }
   0x6   :  { %598 = vmatprep.subr.bf16.mxu0 %v45_v5  ;;  %v49_v18 = vpack.c.bf16 %v793_v17, %v788_v16  ;;  %v50_v21 = vpack.c.bf16 %v805_v20, %v800_v19  ;;  %v812_v22 = vld [vmem:[%s1034_s1 + $0x70] sm:$0xff]  ;;  %v817_v23 = vld [vmem:[%s1034_s1 + $0x78] sm:$0xff]  ;;  %v824_v25 = vld [vmem:[%s1035_s0 + $0x8] sm:$0xff]   ;;  %v877_v49 = vmul.f32 0.1, %v749_v6 }
   0x7   :  { %v51_v24 = vpack.c.bf16 %v817_v23, %v812_v22  ;;  %v829_v26 = vld [vmem:[%s1035_s0 + $0x10] sm:$0xff]   ;;  %v836_v27 = vld [vmem:[%s1035_s0 + $0x18] sm:$0xff]   ;;  %v841_v28 = vld [vmem:[%s1035_s0 + $0x20] sm:$0xff]   ;;  %v880_v50 = vmul.f32 0.1, %v761_v9 }
   0x8   :  { %v848_v29 = vld [vmem:[%s1035_s0 + $0x28] sm:$0xff]   ;;  %v853_v30 = vld [vmem:[%s1035_s0 + $0x30] sm:$0xff]   ;;  %v860_v31 = vld [vmem:[%s1035_s0 + $0x38] sm:$0xff]   ;;  %v883_v53 = vmul.f32 0.1, %v766_v10 }
   0x9   :  { %599 = vmatpush3.bf16.msra.mxu0 %v45_v5  ;;  %v886_v56 = vmul.f32 0.1, %v754_v7  ;;  %v893_v3 = vmul.f32 0.1, %v774_v12  ;;  %v896_v4 = vmul.f32 0.1, %v788_v16 }
   0xa   :  { %600 = vmatprep.subr.bf16.mxu0 %v46_v8  ;;  %v899_v7 = vmul.f32 0.1, %v793_v17  ;;  %v902_v10 = vmul.f32 0.1, %v781_v14  ;;  %v909_v14 = vmul.f32 0.1, %v800_v19 }
   0xd   :  { %601 = vmatpush3.bf16.msra.mxu0 %v46_v8 }
   0xe   :  { %602 = vmatprep.subr.bf16.mxu0 %v47_v13 }
  0x11   :  { %603 = vmatpush3.bf16.msra.mxu0 %v47_v13 }
  0x12   :  { %604 = vmatprep.subr.bf16.mxu0 %v48_v15 }
  0x15   :  { %605 = vmatpush3.bf16.msra.mxu0 %v48_v15 }
  0x16   :  { %606 = vmatprep.subr.bf16.mxu0 %v49_v18 }
  0x19   :  { %607 = vmatpush3.bf16.msra.mxu0 %v49_v18 }
  0x1a   :  { %608 = vmatprep.subr.bf16.mxu0 %v50_v21 }
  0x1d   :  { %609 = vmatpush3.bf16.msra.mxu0 %v50_v21 }
  0x1e   :  { %610 = vmatprep.subr.bf16.mxu0 %v51_v24 }
  0x21   :  { %611 = vmatpush3.bf16.msra.mxu0 %v51_v24 }
  0x24   :  { %613 = vmatmul.mubr.bf16.vlgmr.msra.gmra.mrb[0].mxu0 %v824_v25 }
  0x25   :  { %616 = vmatprep.mubr.bf16.mxu0 %v829_v26 }
  0x2c   :  { %617 = vmatmul.mubr.bf16.gmra.mrb[4].mxu0 %v836_v27 }
  0x2d   :  { %620 = vmatprep.mubr.bf16.mxu0 %v841_v28 }
  0x34   :  { %621 = vmatmul.mubr.bf16.gmra.mrb[8].mxu0 %v848_v29 }
  0x35   :  { %624 = vmatprep.mubr.bf16.mxu0 %v853_v30 }
  0x3c   :  { %625 = vmatmul.mubr.bf16.gmra.mrb[12].mxu0 %v860_v31 }
  0x3d   :  { %676 = vmatprep.mubr.bf16.mxu0 %v708_v11 }
  0xf7   :  { %v614_v34 = vpop.f32.mrb[0].mxu0 }
  0xf8   :  { %v199_v36 = vmul.f32 0.9, %v614_v34  ;;  %v134_v37 = vpop.f32.mrb[1].mxu0 }
  0xf9   :  { %v197_v39 = vmul.f32 0.9, %v134_v37  ;;  %v615_v40 = vpop.f32.mrb[2].mxu0 }
  0xfa   :  { %v200_v41 = vmul.f32 0.9, %v615_v40  ;;  %v137_v42 = vpop.f32.mrb[3].mxu0  ;;  %v231_v44 = vadd.f32 %v865_v33, %v199_v36  ;;  %v912_v36 = vmul.f32 0.1, %v812_v22 }
  0xfb   :  { %v198_v43 = vmul.f32 0.9, %v137_v42  ;;  %v229_v46 = vadd.f32 %v863_v32, %v197_v39  ;;  %v915_v40 = vmul.f32 0.1, %v817_v23 }
  0xfc   :  { %v232_v45 = vadd.f32 %v867_v35, %v200_v41 }
  0xfd   :  { %v230_v47 = vadd.f32 %v870_v38, %v198_v43  ;;  %v918_v43 = vmul.f32 0.1, %v805_v20 }
  0xfe   :  { %v246_v48 = vpack.c.bf16 %v232_v45, %v231_v44 }
  0xff   :  { %v618_v51 = vpop.f32.mrb[4].mxu0  ;;  %v245_v52 = vpack.c.bf16 %v230_v47, %v229_v46 }
 0x100   :  { %v203_v54 = vmul.f32 0.9, %v618_v51  ;;  %v150_v55 = vpop.f32.mrb[5].mxu0 }
 0x101   :  { %v201_v57 = vmul.f32 0.9, %v150_v55  ;;  %v619_v58 = vpop.f32.mrb[6].mxu0  ;;  %628 = vmatprep.subr.bf16.mxu1 %v245_v52 }
 0x102   :  { %v204_v59 = vmul.f32 0.9, %v619_v58  ;;  %v153_v60 = vpop.f32.mrb[7].mxu0  ;;  %629 = vmatpush3.bf16.msra.mxu1 %v245_v52  ;;  %v235_v62 = vadd.f32 %v880_v50, %v203_v54 }
 0x103   :  { %v202_v61 = vmul.f32 0.9, %v153_v60  ;;  %630 = vmatprep.subr.bf16.mxu1 %v246_v48  ;;  %v233_v0 = vadd.f32 %v877_v49, %v201_v57 }
 0x104   :  { %v236_v63 = vadd.f32 %v883_v53, %v204_v59 }
 0x105   :  { %v234_v1 = vadd.f32 %v886_v56, %v202_v61 }
 0x106   :  { %631 = vmatpush3.bf16.msra.mxu1 %v246_v48  ;;  %v248_v2 = vpack.c.bf16 %v236_v63, %v235_v62 }
 0x107   :  { %v622_v5 = vpop.f32.mrb[8].mxu0  ;;  %v247_v6 = vpack.c.bf16 %v234_v1, %v233_v0 }
 0x108   :  { %v207_v8 = vmul.f32 0.9, %v622_v5  ;;  %v166_v9 = vpop.f32.mrb[9].mxu0 }
 0x109   :  { %v205_v11 = vmul.f32 0.9, %v166_v9  ;;  %v623_v13 = vpop.f32.mrb[10].mxu0  ;;  %632 = vmatprep.subr.bf16.mxu1 %v247_v6 }
 0x10a   :  { %v208_v15 = vmul.f32 0.9, %v623_v13  ;;  %v169_v18 = vpop.f32.mrb[11].mxu0  ;;  %633 = vmatpush3.bf16.msra.mxu1 %v247_v6  ;;  %v239_v16 = vadd.f32 %v896_v4, %v207_v8 }
 0x10b   :  { %v206_v12 = vmul.f32 0.9, %v169_v18  ;;  %634 = vmatprep.subr.bf16.mxu1 %v248_v2  ;;  %v237_v17 = vadd.f32 %v893_v3, %v205_v11 }
 0x10c   :  { %v240_v21 = vadd.f32 %v899_v7, %v208_v15 }
 0x10d   :  { %v238_v24 = vadd.f32 %v902_v10, %v206_v12 }
 0x10e   :  { %635 = vmatpush3.bf16.msra.mxu1 %v248_v2  ;;  %v250_v34 = vpack.c.bf16 %v240_v21, %v239_v16 }
 0x10f   :  { %v626_v37 = vpop.f32.mrb[12].mxu0  ;;  %v249_v39 = vpack.c.bf16 %v238_v24, %v237_v17 }
 0x110   :  { %v211_v41 = vmul.f32 0.9, %v626_v37  ;;  %v182_v42 = vpop.f32.mrb[13].mxu0 }
 0x111   :  { %v209_v44 = vmul.f32 0.9, %v182_v42  ;;  %v627_v45 = vpop.f32.mrb[14].mxu0  ;;  %636 = vmatprep.subr.bf16.mxu1 %v249_v39 }
 0x112   :  { %v212_v46 = vmul.f32 0.9, %v627_v45  ;;  %v185_v47 = vpop.f32.mrb[15].mxu0  ;;  %637 = vmatpush3.bf16.msra.mxu1 %v249_v39  ;;  %v243_v22 = vadd.f32 %v912_v36, %v211_v41 }
 0x113   :  { %v210_v19 = vmul.f32 0.9, %v185_v47  ;;  %638 = vmatprep.subr.bf16.mxu1 %v250_v34  ;;  %v241_v23 = vadd.f32 %v909_v14, %v209_v44 }
 0x114   :  { %v244_v48 = vadd.f32 %v915_v40, %v212_v46 }
 0x115   :  { %v242_v51 = vadd.f32 %v918_v43, %v210_v19 }
 0x116   :  { %639 = vmatpush3.bf16.msra.mxu1 %v250_v34  ;;  %v252_v52 = vpack.c.bf16 %v244_v48, %v243_v22 }
 0x117   :  { %v251_v20 = vpack.c.bf16 %v242_v51, %v241_v23 }
 0x119   :  { %640 = vmatprep.subr.bf16.mxu1 %v251_v20 }
 0x11a   :  { %641 = vmatpush3.bf16.msra.mxu1 %v251_v20 }
 0x11b   :  { %642 = vmatprep.subr.bf16.mxu1 %v252_v52 }
 0x11e   :  { %643 = vmatpush3.bf16.msra.mxu1 %v252_v52 }
 0x121   :  { %645 = vmatmul.mubr.bf16.vlgmr.msra.gmra.mrb[0].mxu1 %v824_v25 }
 0x122   :  { %648 = vmatprep.mubr.bf16.mxu1 %v829_v26 }
 0x129   :  { %649 = vmatmul.mubr.bf16.gmra.mrb[4].mxu1 %v836_v27 }
 0x12a   :  { %652 = vmatprep.mubr.bf16.mxu1 %v841_v28 }
 0x131   :  { %653 = vmatmul.mubr.bf16.gmra.mrb[8].mxu1 %v848_v29 }
 0x132   :  { %656 = vmatprep.mubr.bf16.mxu1 %v853_v30 }
 0x139   :  { %657 = vmatmul.mubr.bf16.gmra.mrb[12].mxu1 %v860_v31 }
 0x13a   :  { %684 = vmatprep.mubr.bf16.mxu1 %v841_v28 }
 0x1f4   :  { %v646_v54 = vpop.f32.mrb[0].mxu1 }
 0x1f5   :  { %v352_v55 = vmul.f32 0.9, %v646_v54  ;;  %v287_v57 = vpop.f32.mrb[1].mxu1 }
 0x1f6   :  { %v350_v58 = vmul.f32 0.9, %v287_v57  ;;  %v647_v59 = vpop.f32.mrb[2].mxu1 }
 0x1f7   :  { %v353_v60 = vmul.f32 0.9, %v647_v59  ;;  %v290_v61 = vpop.f32.mrb[3].mxu1  ;;  %v368_v63 = vadd.f32 %v352_v55, %v865_v33 }
 0x1f8   :  { %v351_v62 = vmul.f32 0.9, %v290_v61  ;;  %v366_v1 = vadd.f32 %v350_v58, %v863_v32 }
 0x1f9   :  { %v369_v0 = vadd.f32 %v353_v60, %v867_v35 }
 0x1fa   :  { %v367_v2 = vadd.f32 %v351_v62, %v870_v38 }
 0x1fb   :  { %v383_v5 = vpack.c.bf16 %v369_v0, %v368_v63 }
 0x1fc   :  { %v382_v6 = vpack.c.bf16 %v367_v2, %v366_v1  ;;  %v650_v8 = vpop.f32.mrb[4].mxu1 }
 0x1fd   :  { %v356_v28 = vmul.f32 0.9, %v650_v8  ;;  %v303_v9 = vpop.f32.mrb[5].mxu1 }
 0x1fe   :  { %v354_v11 = vmul.f32 0.9, %v303_v9  ;;  %v651_v13 = vpop.f32.mrb[6].mxu1  ;;  %660 = vmatprep.subr.bf16.mxu0 %v382_v6  ;;  %692 = vmatprep.subr.bf16.mxu1 %v382_v6 }
 0x1ff   :  { %v357_v15 = vmul.f32 0.9, %v651_v13  ;;  %v306_v18 = vpop.f32.mrb[7].mxu1  ;;  %661 = vmatpush3.bf16.msra.mxu0 %v382_v6  ;;  %700 = vmatpush3.bf16.msra.mxu1 %v382_v6  ;;  %v372_v16 = vadd.f32 %v356_v28, %v880_v50 }
 0x200   :  { %v355_v12 = vmul.f32 0.9, %v306_v18  ;;  %662 = vmatprep.subr.bf16.mxu0 %v383_v5  ;;  %693 = vmatprep.subr.bf16.mxu1 %v383_v5  ;;  %v370_v17 = vadd.f32 %v354_v11, %v877_v49 }
 0x201   :  { %v373_v21 = vadd.f32 %v357_v15, %v883_v53 }
 0x202   :  { %v371_v24 = vadd.f32 %v355_v12, %v886_v56 }
 0x203   :  { %v385_v34 = vpack.c.bf16 %v373_v21, %v372_v16  ;;  %663 = vmatpush3.bf16.msra.mxu0 %v383_v5  ;;  %701 = vmatpush3.bf16.msra.mxu1 %v383_v5 }
 0x204   :  { %v384_v37 = vpack.c.bf16 %v371_v24, %v370_v17  ;;  %v654_v39 = vpop.f32.mrb[8].mxu1 }
 0x205   :  { %v360_v41 = vmul.f32 0.9, %v654_v39  ;;  %v319_v42 = vpop.f32.mrb[9].mxu1 }
 0x206   :  { %v358_v44 = vmul.f32 0.9, %v319_v42  ;;  %v655_v45 = vpop.f32.mrb[10].mxu1  ;;  %664 = vmatprep.subr.bf16.mxu0 %v384_v37  ;;  %694 = vmatprep.subr.bf16.mxu1 %v384_v37 }
 0x207   :  { %v361_v46 = vmul.f32 0.9, %v655_v45  ;;  %v322_v47 = vpop.f32.mrb[11].mxu1  ;;  %665 = vmatpush3.bf16.msra.mxu0 %v384_v37  ;;  %702 = vmatpush3.bf16.msra.mxu1 %v384_v37  ;;  %v376_v22 = vadd.f32 %v360_v41, %v896_v4 }
 0x208   :  { %v359_v19 = vmul.f32 0.9, %v322_v47  ;;  %666 = vmatprep.subr.bf16.mxu0 %v385_v34  ;;  %695 = vmatprep.subr.bf16.mxu1 %v385_v34  ;;  %v374_v23 = vadd.f32 %v358_v44, %v893_v3 }
 0x209   :  { %v377_v48 = vadd.f32 %v361_v46, %v899_v7 }
 0x20a   :  { %v375_v51 = vadd.f32 %v359_v19, %v902_v10 }
 0x20b   :  { %v387_v52 = vpack.c.bf16 %v377_v48, %v376_v22  ;;  %667 = vmatpush3.bf16.msra.mxu0 %v385_v34  ;;  %703 = vmatpush3.bf16.msra.mxu1 %v385_v34 }
 0x20c   :  { %v386_v20 = vpack.c.bf16 %v375_v51, %v374_v23  ;;  %v658_v54 = vpop.f32.mrb[12].mxu1 }
 0x20d   :  { %v364_v55 = vmul.f32 0.9, %v658_v54  ;;  %v335_v57 = vpop.f32.mrb[13].mxu1 }
 0x20e   :  { %v362_v58 = vmul.f32 0.9, %v335_v57  ;;  %v659_v59 = vpop.f32.mrb[14].mxu1  ;;  %668 = vmatprep.subr.bf16.mxu0 %v386_v20  ;;  %696 = vmatprep.subr.bf16.mxu1 %v386_v20 }
 0x20f   :  { %v365_v60 = vmul.f32 0.9, %v659_v59  ;;  %v338_v61 = vpop.f32.mrb[15].mxu1  ;;  %669 = vmatpush3.bf16.msra.mxu0 %v386_v20  ;;  %704 = vmatpush3.bf16.msra.mxu1 %v386_v20  ;;  %v380_v63 = vadd.f32 %v364_v55, %v912_v36 }
 0x210   :  { %v363_v62 = vmul.f32 0.9, %v338_v61  ;;  %670 = vmatprep.subr.bf16.mxu0 %v387_v52  ;;  %697 = vmatprep.subr.bf16.mxu1 %v387_v52  ;;  %v378_v1 = vadd.f32 %v362_v58, %v909_v14 }
 0x211   :  { %v381_v0 = vadd.f32 %v365_v60, %v915_v40 }
 0x212   :  { %v379_v2 = vadd.f32 %v363_v62, %v918_v43 }
 0x213   :  { %v389_v5 = vpack.c.bf16 %v381_v0, %v380_v63  ;;  %671 = vmatpush3.bf16.msra.mxu0 %v387_v52  ;;  %705 = vmatpush3.bf16.msra.mxu1 %v387_v52 }
 0x214   :  { %v388_v6 = vpack.c.bf16 %v379_v2, %v378_v1 }
 0x216   :  { %672 = vmatprep.subr.bf16.mxu0 %v388_v6  ;;  %698 = vmatprep.subr.bf16.mxu1 %v388_v6 }
 0x217   :  { %673 = vmatpush3.bf16.msra.mxu0 %v388_v6  ;;  %706 = vmatpush3.bf16.msra.mxu1 %v388_v6 }
 0x218   :  { %674 = vmatprep.subr.bf16.mxu0 %v389_v5  ;;  %699 = vmatprep.subr.bf16.mxu1 %v389_v5 }
 0x21b   :  { %675 = vmatpush3.bf16.msra.mxu0 %v389_v5  ;;  %707 = vmatpush3.bf16.msra.mxu1 %v389_v5 }
 0x21e   :  { %677 = vmatmul.mubr.bf16.vlgmr.msra.gmra.mrb[16].mxu0 %v824_v25  ;;  %685 = vmatmul.mubr.bf16.vlgmr.msra.gmra.mrb[16].mxu1 %v848_v29 }
 0x21f   :  { %680 = vmatprep.mubr.bf16.mxu0 %v829_v26  ;;  %688 = vmatprep.mubr.bf16.mxu1 %v853_v30 }
 0x226   :  { %681 = vmatmul.mubr.bf16.gmra.mrb[20].mxu0 %v836_v27  ;;  %689 = vmatmul.mubr.bf16.gmra.mrb[20].mxu1 %v860_v31 }
 0x2f1   :  { %v678_v8 = vpop.f32.mrb[16].mxu0  ;;  %v686_v28 = vpop.f32.mrb[16].mxu1 }
 0x2f2   :  { %v489_v9 = vmul.f32 0.9, %v678_v8  ;;  %v497_v11 = vmul.f32 0.9, %v686_v28  ;;  %v424_v13 = vpop.f32.mrb[17].mxu0  ;;  %v456_v15 = vpop.f32.mrb[17].mxu1 }
 0x2f3   :  { %v487_v18 = vmul.f32 0.9, %v424_v13  ;;  %v495_v12 = vmul.f32 0.9, %v456_v15  ;;  %v679_v25 = vpop.f32.mrb[18].mxu0  ;;  %v687_v16 = vpop.f32.mrb[18].mxu1 }
 0x2f4   :  { %v505_v29 = vadd.f32 %v489_v9, %v865_v33  ;;  %v513_v26 = vadd.f32 %v497_v11, %v896_v4  ;;  %v490_v30 = vmul.f32 0.9, %v679_v25  ;;  %v498_v21 = vmul.f32 0.9, %v687_v16  ;;  %v427_v27 = vpop.f32.mrb[19].mxu0  ;;  %v459_v17 = vpop.f32.mrb[19].mxu1 }
 0x2f5   :  { %v503_v31 = vadd.f32 %v487_v18, %v863_v32  ;;  %v511_v24 = vadd.f32 %v495_v12, %v893_v3  ;;  %v488_v34 = vmul.f32 0.9, %v427_v27  ;;  %v496_v37 = vmul.f32 0.9, %v459_v17 }
 0x2f6   :  { %522 = vst.msk [vmem:[%s1036_s2 + $0x10] sm:$0xff] %vm519_vm0, %v505_v29  ;;  %530 = vst.msk [vmem:[%s1036_s2 + $0x50] sm:$0xff] %vm519_vm0, %v513_v26  ;;  %v506_v33 = vadd.f32 %v490_v30, %v867_v35  ;;  %v514_v4 = vadd.f32 %v498_v21, %v899_v7 }
 0x2f7   :  { %520 = vst.msk [vmem:[%s1036_s2] sm:$0xff] %vm519_vm0, %v503_v31  ;;  %528 = vst.msk [vmem:[%s1036_s2 + $0x40] sm:$0xff] %vm519_vm0, %v511_v24  ;;  %v504_v32 = vadd.f32 %v488_v34, %v870_v38  ;;  %v512_v3 = vadd.f32 %v496_v37, %v902_v10 }
 0x2f8   :  { %523 = vst.msk [vmem:[%s1036_s2 + $0x18] sm:$0xff] %vm519_vm0, %v506_v33  ;;  %531 = vst.msk [vmem:[%s1036_s2 + $0x58] sm:$0xff] %vm519_vm0, %v514_v4 }
 0x2f9   :  { %521 = vst.msk [vmem:[%s1036_s2 + $0x8] sm:$0xff] %vm519_vm0, %v504_v32  ;;  %529 = vst.msk [vmem:[%s1036_s2 + $0x48] sm:$0xff] %vm519_vm0, %v512_v3  ;;  %v682_v35 = vpop.f32.mrb[20].mxu0  ;;  %v690_v38 = vpop.f32.mrb[20].mxu1 }
 0x2fa   :  { %v493_v7 = vmul.f32 0.9, %v682_v35  ;;  %v501_v10 = vmul.f32 0.9, %v690_v38  ;;  %v440_v39 = vpop.f32.mrb[21].mxu0  ;;  %v472_v41 = vpop.f32.mrb[21].mxu1 }
 0x2fb   :  { %v491_v42 = vmul.f32 0.9, %v440_v39  ;;  %v499_v44 = vmul.f32 0.9, %v472_v41  ;;  %v683_v45 = vpop.f32.mrb[22].mxu0  ;;  %v691_v46 = vpop.f32.mrb[22].mxu1 }
 0x2fc   :  { %v509_v47 = vadd.f32 %v493_v7, %v880_v50  ;;  %v517_v19 = vadd.f32 %v501_v10, %v912_v36  ;;  %v494_v22 = vmul.f32 0.9, %v683_v45  ;;  %v502_v48 = vmul.f32 0.9, %v691_v46  ;;  %v443_v23 = vpop.f32.mrb[23].mxu0  ;;  %v475_v51 = vpop.f32.mrb[23].mxu1 }
 0x2fd   :  { %v507_v52 = vadd.f32 %v491_v42, %v877_v49  ;;  %v515_v20 = vadd.f32 %v499_v44, %v909_v14  ;;  %v492_v54 = vmul.f32 0.9, %v443_v23  ;;  %v500_v55 = vmul.f32 0.9, %v475_v51 }
 0x2fe   :  { %526 = vst.msk [vmem:[%s1036_s2 + $0x30] sm:$0xff] %vm519_vm0, %v509_v47  ;;  %534 = vst.msk [vmem:[%s1036_s2 + $0x70] sm:$0xff] %vm519_vm0, %v517_v19  ;;  %v510_v50 = vadd.f32 %v494_v22, %v883_v53  ;;  %v518_v36 = vadd.f32 %v502_v48, %v915_v40 }
 0x2ff   :  { %524 = vst.msk [vmem:[%s1036_s2 + $0x20] sm:$0xff] %vm519_vm0, %v507_v52  ;;  %532 = vst.msk [vmem:[%s1036_s2 + $0x60] sm:$0xff] %vm519_vm0, %v515_v20  ;;  %v508_v49 = vadd.f32 %v492_v54, %v886_v56  ;;  %v516_v14 = vadd.f32 %v500_v55, %v918_v43 }
 0x300   :  { %527 = vst.msk [vmem:[%s1036_s2 + $0x38] sm:$0xff] %vm519_vm0, %v510_v50  ;;  %535 = vst.msk [vmem:[%s1036_s2 + $0x78] sm:$0xff] %vm519_vm0, %v518_v36 }
 0x301   :  { %525 = vst.msk [vmem:[%s1036_s2 + $0x28] sm:$0xff] %vm519_vm0, %v508_v49  ;;  %533 = vst.msk [vmem:[%s1036_s2 + $0x68] sm:$0xff] %vm519_vm0, %v516_v14 }

</bundles_post_ra>
